<compile_context>
chip_gen: v7x
topology: tpu7x:2x2x1
jax: 0.10.0
libtpu: 0.0.40
codegen_flags: <defaults>
</compile_context>

<pallas_src>
import functools

import jax
import jax.numpy as jnp
from jax.experimental import pallas as pl
from jax.experimental.pallas import tpu as pltpu


# ------------------------------ Pallas kernel ------------------------------ #

def _basic_block_kernel(x_ref, w1_ref, b1_ref, w2_ref, b2_ref, m_ref, o_ref,
                        *, hw, width):
    """Fused BasicBlock forward for one batch block (channel-major layout).

    x_ref : (B, Cin, HW)    f32   input activations, HW (=H*W) on the lane axis
    w1_ref: (9, Cmid, Cin)  bf16  conv1 per-tap weights (BN1 scale folded in)
    b1_ref: (Cmid, 1)       f32   folded BN1 bias
    w2_ref: (9, Cout, Cmid) bf16  conv2 per-tap weights (BN2 scale folded in)
    b2_ref: (Cout, 1)       f32   folded BN2 bias
    m_ref : (9, 1, HW)      bf16  0/1 validity mask per tap (zero-pad emulation)
    o_ref : (B, Cout, HW)   f32   output activations (lane-dense)
    """
    # 3x3 tap offsets in flattened row-major spatial coordinates, (kh, kw) order
    # matching the weight reshape in the wrapper.
    offsets = [dh * width + dw for dh in (-1, 0, 1) for dw in (-1, 0, 1)]
    b1 = b1_ref[...]
    b2 = b2_ref[...]

    def conv3x3(act_f32, w_ref):
        # 3x3 "same" conv as 9 accumulating MXU dots on lane-shifted taps.
        centre = act_f32.astype(jnp.bfloat16)
        acc = None
        for t, off in enumerate(offsets):
            if off == 0:
                tap = centre                                  # mask is all-ones
            else:
                # tap[p] = act[p + off]; out-of-image positions zeroed by mask.
                shifted = pltpu.roll(act_f32, shift=(-off) % hw, axis=1)
                tap = shifted.astype(jnp.bfloat16) * m_ref[t]
            part = jnp.dot(w_ref[t], tap, preferred_element_type=jnp.float32)
            acc = part if acc is None else acc + part
        return acc                                            # (C, HW) f32

    for b in range(x_ref.shape[0]):        # unrolled over images in this block
        xf = x_ref[b]                                         # (Cin, HW) f32
        # conv1 + folded BN1 + ReLU (intermediate stays in vregs, never in HBM)
        y = jnp.maximum(conv3x3(xf, w1_ref) + b1, 0.0)
        # conv2 + folded BN2 + residual add; NO ReLU after the add.
        z = conv3x3(y, w2_ref) + b2
        o_ref[b] = z + xf


# ------------------------------- JAX wrapper -------------------------------- #

def basic_block_forward(x_nchw, params, *, batch_block=None):
    """Pallas forward for BasicBlock (stride=1, pad=1, dilation=1, no downsample)."""
    n, cin, h, w = x_nchw.shape
    hw = h * w

    w1 = params["w1"]            # (3, 3, cin, planes) HWIO, BN1 scale folded, bf16
    w2 = params["w2"]            # (3, 3, planes, planes) HWIO, BN2 scale folded, bf16
    planes = w1.shape[-1]
    cout = w2.shape[-1]
    assert cin == cout, "residual add needs inplanes == planes (downsample=None)"

    if batch_block is None:
        # Amortize per-grid-step overhead (serial grid on v5e/v6e) while keeping
        # >= 2 grid steps so the batch axis still shards over v7x's two TCs, and
        # keeping the per-step activation footprint modest.
        batch_block = max(1, n // 2)
        per_image_bytes = (cin + cout) * hw * 4
        batch_block = max(1, min(batch_block, (2 << 20) // max(per_image_bytes, 1)))
        while n % batch_block:
            batch_block -= 1
    assert n % batch_block == 0

    # Channel-major / spatial-last: NCHW -> (N, C, HW) is a free reshape (no
    # transpose), and HW sits on the 128-lane axis.
    x_flat = x_nchw.reshape(n, cin, hw).astype(jnp.float32)

    # Per-tap (Cout, Cin) weight matrices, tap order (kh, kw) row-major.
    w1k = jnp.transpose(w1, (0, 1, 3, 2)).reshape(9, planes, cin)
    w2k = jnp.transpose(w2, (0, 1, 3, 2)).reshape(9, cout, planes)
    b1 = params["b1"].reshape(planes, 1).astype(jnp.float32)
    b2 = params["b2"].reshape(cout, 1).astype(jnp.float32)

    # 0/1 validity masks emulating zero padding for each lane-shifted tap
    # (shape-only constants; folded at compile time under jit).
    hh = jnp.arange(h).reshape(h, 1)
    ww = jnp.arange(w).reshape(1, w)
    mask_rows = []
    for dh in (-1, 0, 1):
        for dw in (-1, 0, 1):
            valid = ((hh + dh >= 0) & (hh + dh < h) &
                     (ww + dw >= 0) & (ww + dw < w))
            mask_rows.append(valid.reshape(hw))
    masks = jnp.stack(mask_rows).reshape(9, 1, hw).astype(jnp.bfloat16)

    kernel = functools.partial(_basic_block_kernel, hw=hw, width=w)

    out = pl.pallas_call(
        kernel,
        out_shape=jax.ShapeDtypeStruct((n, cout, hw), jnp.float32),
        grid_spec=pltpu.PrefetchScalarGridSpec(
            num_scalar_prefetch=0,
            grid=(n // batch_block,),
            in_specs=[
                pl.BlockSpec((batch_block, cin, hw), lambda i: (i, 0, 0)),
                pl.BlockSpec((9, planes, cin), lambda i: (0, 0, 0)),
                pl.BlockSpec((planes, 1), lambda i: (0, 0)),
                pl.BlockSpec((9, cout, planes), lambda i: (0, 0, 0)),
                pl.BlockSpec((cout, 1), lambda i: (0, 0)),
                pl.BlockSpec((9, 1, hw), lambda i: (0, 0, 0)),
            ],
            out_specs=pl.BlockSpec((batch_block, cout, hw), lambda i: (i, 0, 0)),
        ),
        compiler_params=pltpu.CompilerParams(
            dimension_semantics=("parallel",)),
    )(x_flat, w1k, b1, w2k, b2, masks)

    # Lane-dense (N, C, HW) -> NCHW is a free reshape (no transpose).
    return out.reshape(n, cout, h, w)


# ---------------------------- parameter creation ----------------------------- #

def init_params(key, inplanes, planes, eps=1e-5):
    """Random BasicBlock params with BatchNorm folded (running-stats semantics)."""
    ks = jax.random.split(key, 10)
    w1 = 0.1 * jax.random.normal(ks[0], (3, 3, inplanes, planes), jnp.float32)
    w2 = 0.1 * jax.random.normal(ks[1], (3, 3, planes, planes), jnp.float32)

    def bn_fold(kg, kb, km, kv):
        gamma = 1.0 + 0.1 * jax.random.normal(kg, (planes,), jnp.float32)
        beta = 0.1 * jax.random.normal(kb, (planes,), jnp.float32)
        mean = 0.05 * jax.random.normal(km, (planes,), jnp.float32)
        var = 1.0 + 0.2 * jax.random.uniform(kv, (planes,), jnp.float32)
        scale = gamma / jnp.sqrt(var + eps)
        bias = beta - mean * scale
        return scale, bias

    s1, b1 = bn_fold(ks[2], ks[3], ks[4], ks[5])
    s2, b2 = bn_fold(ks[6], ks[7], ks[8], ks[9])

    # Fold the BN scale into the conv weights (one-time, wrapper-side) and cast
    # to bf16 so the MXU runs at native precision. Biases stay f32.
    return {
        "w1": (w1 * s1).astype(jnp.bfloat16),
        "b1": b1,
        "w2": (w2 * s2).astype(jnp.bfloat16),
        "b2": b2,
    }


# --------------------------------- reference --------------------------------- #

def _ref_forward(x_nchw, params):
    """Pure-JAX reference with matching bf16-matmul / f32-epilogue semantics."""
    def conv(a, wt):
        return jax.lax.conv_general_dilated(
            a.astype(jnp.bfloat16), wt, window_strides=(1, 1),
            padding=((1, 1), (1, 1)),
            dimension_numbers=("NHWC", "HWIO", "NHWC"),
            preferred_element_type=jnp.float32)

    x = jnp.transpose(x_nchw, (0, 2, 3, 1)).astype(jnp.float32)
    y = jnp.maximum(conv(x, params["w1"]) + params["b1"], 0.0)
    out = conv(y, params["w2"]) + params["b2"] + x
    return jnp.transpose(out, (0, 3, 1, 2))


if __name__ == "__main__":
    key = jax.random.PRNGKey(0)
    kx, kp = jax.random.split(key)

    N, C, H, W = 2, 8, 16, 16          # NCHW input, inplanes == planes == 8
    x = jax.random.normal(kx, (N, C, H, W), jnp.float32)
    params = init_params(kp, C, C)

    fwd = jax.jit(basic_block_forward)
    out = jax.block_until_ready(fwd(x, params))

    ref = _ref_forward(x, params)
    assert out.shape == (N, C, H, W)
    max_err = float(jnp.max(jnp.abs(out - ref)))
    # bf16 matmuls: tolerance covers accumulation-order / bf16-rounding noise.
    assert max_err < 5e-3, f"mismatch vs reference: {max_err}"

    print("KERNEL_OK")
</pallas_src>

<mosaic_0001>
module attributes {stable_mosaic.version = 11 : i64} {
  func.func @_basic_block_kernel(%arg0: i32, %arg1: memref<1x8x256xf32, #tpu.memory_space<vmem>>, %arg2: memref<9x8x8xbf16, #tpu.memory_space<vmem>>, %arg3: memref<8x1xf32, #tpu.memory_space<vmem>>, %arg4: memref<9x8x8xbf16, #tpu.memory_space<vmem>>, %arg5: memref<8x1xf32, #tpu.memory_space<vmem>>, %arg6: memref<9x1x256xbf16, #tpu.memory_space<vmem>>, %arg7: memref<1x8x256xf32, #tpu.memory_space<vmem>>) attributes {dimension_semantics = [#tpu.dimension_semantics<parallel>], iteration_bounds = array<i64: 2>, scalar_prefetch = 0 : i64, scratch_operands = 0 : i64, tpu.core_type = #tpu.core_type<tc>, window_params = [{transform_indices = @transform_0, window_bounds = array<i64: 1, 8, 256>}, {pipeline_mode = #tpu.pipeline_mode<synchronous>, transform_indices = @transform_1, window_bounds = array<i64: 9, 8, 8>}, {pipeline_mode = #tpu.pipeline_mode<synchronous>, transform_indices = @transform_2, window_bounds = array<i64: 8, 1>}, {pipeline_mode = #tpu.pipeline_mode<synchronous>, transform_indices = @transform_3, window_bounds = array<i64: 9, 8, 8>}, {pipeline_mode = #tpu.pipeline_mode<synchronous>, transform_indices = @transform_4, window_bounds = array<i64: 8, 1>}, {pipeline_mode = #tpu.pipeline_mode<synchronous>, transform_indices = @transform_5, window_bounds = array<i64: 9, 1, 256>}, {transform_indices = @transform_6, window_bounds = array<i64: 1, 8, 256>}]} {
    %c0 = arith.constant 0 : index
    %c0_0 = arith.constant 0 : index
    %0 = vector.load %arg3[%c0, %c0_0] : memref<8x1xf32, #tpu.memory_space<vmem>>, vector<8x1xf32>
    %c0_1 = arith.constant 0 : index
    %c0_2 = arith.constant 0 : index
    %1 = vector.load %arg5[%c0_1, %c0_2] : memref<8x1xf32, #tpu.memory_space<vmem>>, vector<8x1xf32>
    %c0_3 = arith.constant 0 : index
    %c0_4 = arith.constant 0 : index
    %c0_5 = arith.constant 0 : index
    %2 = vector.load %arg1[%c0_3, %c0_4, %c0_5] : memref<1x8x256xf32, #tpu.memory_space<vmem>>, vector<1x8x256xf32>
    %3 = vector.shape_cast %2 : vector<1x8x256xf32> to vector<8x256xf32>
    %4 = arith.truncf %3 : vector<8x256xf32> to vector<8x256xbf16>
    %c17_i32 = arith.constant 17 : i32
    %5 = tpu.dynamic_rotate %3 by %c17_i32 dim 1 : vector<8x256xf32>, i32 -> vector<8x256xf32>
    %6 = arith.truncf %5 : vector<8x256xf32> to vector<8x256xbf16>
    %c0_6 = arith.constant 0 : index
    %c0_7 = arith.constant 0 : index
    %c0_8 = arith.constant 0 : index
    %7 = vector.load %arg6[%c0_6, %c0_7, %c0_8] : memref<9x1x256xbf16, #tpu.memory_space<vmem>>, vector<1x1x256xbf16>
    %8 = vector.shape_cast %7 : vector<1x1x256xbf16> to vector<1x256xbf16>
    %9 = vector.broadcast %8 : vector<1x256xbf16> to vector<8x256xbf16>
    %10 = arith.mulf %6, %9 : vector<8x256xbf16>
    %c0_9 = arith.constant 0 : index
    %c0_10 = arith.constant 0 : index
    %c0_11 = arith.constant 0 : index
    %11 = vector.load %arg2[%c0_9, %c0_10, %c0_11] : memref<9x8x8xbf16, #tpu.memory_space<vmem>>, vector<1x8x8xbf16>
    %12 = vector.shape_cast %11 : vector<1x8x8xbf16> to vector<8x8xbf16>
    %cst = arith.constant dense<0.000000e+00> : vector<8x256xf32>
    %13 = tpu.matmul %12, %10, %cst {dimension_numbers = #tpu.dot_dimension_numbers<[1], [0], [0], [1], [0, 0, 1, 1], [], []>} : vector<8x8xbf16>, vector<8x256xbf16>, vector<8x256xf32> -> vector<8x256xf32>
    %c16_i32 = arith.constant 16 : i32
    %14 = tpu.dynamic_rotate %3 by %c16_i32 dim 1 : vector<8x256xf32>, i32 -> vector<8x256xf32>
    %15 = arith.truncf %14 : vector<8x256xf32> to vector<8x256xbf16>
    %c1 = arith.constant 1 : index
    %c0_12 = arith.constant 0 : index
    %c0_13 = arith.constant 0 : index
    %16 = vector.load %arg6[%c1, %c0_12, %c0_13] : memref<9x1x256xbf16, #tpu.memory_space<vmem>>, vector<1x1x256xbf16>
    %17 = vector.shape_cast %16 : vector<1x1x256xbf16> to vector<1x256xbf16>
    %18 = vector.broadcast %17 : vector<1x256xbf16> to vector<8x256xbf16>
    %19 = arith.mulf %15, %18 : vector<8x256xbf16>
    %c1_14 = arith.constant 1 : index
    %c0_15 = arith.constant 0 : index
    %c0_16 = arith.constant 0 : index
    %20 = vector.load %arg2[%c1_14, %c0_15, %c0_16] : memref<9x8x8xbf16, #tpu.memory_space<vmem>>, vector<1x8x8xbf16>
    %21 = vector.shape_cast %20 : vector<1x8x8xbf16> to vector<8x8xbf16>
    %cst_17 = arith.constant dense<0.000000e+00> : vector<8x256xf32>
    %22 = tpu.matmul %21, %19, %cst_17 {dimension_numbers = #tpu.dot_dimension_numbers<[1], [0], [0], [1], [0, 0, 1, 1], [], []>} : vector<8x8xbf16>, vector<8x256xbf16>, vector<8x256xf32> -> vector<8x256xf32>
    %23 = arith.addf %13, %22 : vector<8x256xf32>
    %c15_i32 = arith.constant 15 : i32
    %24 = tpu.dynamic_rotate %3 by %c15_i32 dim 1 : vector<8x256xf32>, i32 -> vector<8x256xf32>
    %25 = arith.truncf %24 : vector<8x256xf32> to vector<8x256xbf16>
    %c2 = arith.constant 2 : index
    %c0_18 = arith.constant 0 : index
    %c0_19 = arith.constant 0 : index
    %26 = vector.load %arg6[%c2, %c0_18, %c0_19] : memref<9x1x256xbf16, #tpu.memory_space<vmem>>, vector<1x1x256xbf16>
    %27 = vector.shape_cast %26 : vector<1x1x256xbf16> to vector<1x256xbf16>
    %28 = vector.broadcast %27 : vector<1x256xbf16> to vector<8x256xbf16>
    %29 = arith.mulf %25, %28 : vector<8x256xbf16>
    %c2_20 = arith.constant 2 : index
    %c0_21 = arith.constant 0 : index
    %c0_22 = arith.constant 0 : index
    %30 = vector.load %arg2[%c2_20, %c0_21, %c0_22] : memref<9x8x8xbf16, #tpu.memory_space<vmem>>, vector<1x8x8xbf16>
    %31 = vector.shape_cast %30 : vector<1x8x8xbf16> to vector<8x8xbf16>
    %cst_23 = arith.constant dense<0.000000e+00> : vector<8x256xf32>
    %32 = tpu.matmul %31, %29, %cst_23 {dimension_numbers = #tpu.dot_dimension_numbers<[1], [0], [0], [1], [0, 0, 1, 1], [], []>} : vector<8x8xbf16>, vector<8x256xbf16>, vector<8x256xf32> -> vector<8x256xf32>
    %33 = arith.addf %23, %32 : vector<8x256xf32>
    %c1_i32 = arith.constant 1 : i32
    %34 = tpu.dynamic_rotate %3 by %c1_i32 dim 1 : vector<8x256xf32>, i32 -> vector<8x256xf32>
    %35 = arith.truncf %34 : vector<8x256xf32> to vector<8x256xbf16>
    %c3 = arith.constant 3 : index
    %c0_24 = arith.constant 0 : index
    %c0_25 = arith.constant 0 : index
    %36 = vector.load %arg6[%c3, %c0_24, %c0_25] : memref<9x1x256xbf16, #tpu.memory_space<vmem>>, vector<1x1x256xbf16>
    %37 = vector.shape_cast %36 : vector<1x1x256xbf16> to vector<1x256xbf16>
    %38 = vector.broadcast %37 : vector<1x256xbf16> to vector<8x256xbf16>
    %39 = arith.mulf %35, %38 : vector<8x256xbf16>
    %c3_26 = arith.constant 3 : index
    %c0_27 = arith.constant 0 : index
    %c0_28 = arith.constant 0 : index
    %40 = vector.load %arg2[%c3_26, %c0_27, %c0_28] : memref<9x8x8xbf16, #tpu.memory_space<vmem>>, vector<1x8x8xbf16>
    %41 = vector.shape_cast %40 : vector<1x8x8xbf16> to vector<8x8xbf16>
    %cst_29 = arith.constant dense<0.000000e+00> : vector<8x256xf32>
    %42 = tpu.matmul %41, %39, %cst_29 {dimension_numbers = #tpu.dot_dimension_numbers<[1], [0], [0], [1], [0, 0, 1, 1], [], []>} : vector<8x8xbf16>, vector<8x256xbf16>, vector<8x256xf32> -> vector<8x256xf32>
    %43 = arith.addf %33, %42 : vector<8x256xf32>
    %c4 = arith.constant 4 : index
    %c0_30 = arith.constant 0 : index
    %c0_31 = arith.constant 0 : index
    %44 = vector.load %arg2[%c4, %c0_30, %c0_31] : memref<9x8x8xbf16, #tpu.memory_space<vmem>>, vector<1x8x8xbf16>
    %45 = vector.shape_cast %44 : vector<1x8x8xbf16> to vector<8x8xbf16>
    %cst_32 = arith.constant dense<0.000000e+00> : vector<8x256xf32>
    %46 = tpu.matmul %45, %4, %cst_32 {dimension_numbers = #tpu.dot_dimension_numbers<[1], [0], [0], [1], [0, 0, 1, 1], [], []>} : vector<8x8xbf16>, vector<8x256xbf16>, vector<8x256xf32> -> vector<8x256xf32>
    %47 = arith.addf %43, %46 : vector<8x256xf32>
    %c255_i32 = arith.constant 255 : i32
    %48 = tpu.dynamic_rotate %3 by %c255_i32 dim 1 : vector<8x256xf32>, i32 -> vector<8x256xf32>
    %49 = arith.truncf %48 : vector<8x256xf32> to vector<8x256xbf16>
    %c5 = arith.constant 5 : index
    %c0_33 = arith.constant 0 : index
    %c0_34 = arith.constant 0 : index
    %50 = vector.load %arg6[%c5, %c0_33, %c0_34] : memref<9x1x256xbf16, #tpu.memory_space<vmem>>, vector<1x1x256xbf16>
    %51 = vector.shape_cast %50 : vector<1x1x256xbf16> to vector<1x256xbf16>
    %52 = vector.broadcast %51 : vector<1x256xbf16> to vector<8x256xbf16>
    %53 = arith.mulf %49, %52 : vector<8x256xbf16>
    %c5_35 = arith.constant 5 : index
    %c0_36 = arith.constant 0 : index
    %c0_37 = arith.constant 0 : index
    %54 = vector.load %arg2[%c5_35, %c0_36, %c0_37] : memref<9x8x8xbf16, #tpu.memory_space<vmem>>, vector<1x8x8xbf16>
    %55 = vector.shape_cast %54 : vector<1x8x8xbf16> to vector<8x8xbf16>
    %cst_38 = arith.constant dense<0.000000e+00> : vector<8x256xf32>
    %56 = tpu.matmul %55, %53, %cst_38 {dimension_numbers = #tpu.dot_dimension_numbers<[1], [0], [0], [1], [0, 0, 1, 1], [], []>} : vector<8x8xbf16>, vector<8x256xbf16>, vector<8x256xf32> -> vector<8x256xf32>
    %57 = arith.addf %47, %56 : vector<8x256xf32>
    %c241_i32 = arith.constant 241 : i32
    %58 = tpu.dynamic_rotate %3 by %c241_i32 dim 1 : vector<8x256xf32>, i32 -> vector<8x256xf32>
    %59 = arith.truncf %58 : vector<8x256xf32> to vector<8x256xbf16>
    %c6 = arith.constant 6 : index
    %c0_39 = arith.constant 0 : index
    %c0_40 = arith.constant 0 : index
    %60 = vector.load %arg6[%c6, %c0_39, %c0_40] : memref<9x1x256xbf16, #tpu.memory_space<vmem>>, vector<1x1x256xbf16>
    %61 = vector.shape_cast %60 : vector<1x1x256xbf16> to vector<1x256xbf16>
    %62 = vector.broadcast %61 : vector<1x256xbf16> to vector<8x256xbf16>
    %63 = arith.mulf %59, %62 : vector<8x256xbf16>
    %c6_41 = arith.constant 6 : index
    %c0_42 = arith.constant 0 : index
    %c0_43 = arith.constant 0 : index
    %64 = vector.load %arg2[%c6_41, %c0_42, %c0_43] : memref<9x8x8xbf16, #tpu.memory_space<vmem>>, vector<1x8x8xbf16>
    %65 = vector.shape_cast %64 : vector<1x8x8xbf16> to vector<8x8xbf16>
    %cst_44 = arith.constant dense<0.000000e+00> : vector<8x256xf32>
    %66 = tpu.matmul %65, %63, %cst_44 {dimension_numbers = #tpu.dot_dimension_numbers<[1], [0], [0], [1], [0, 0, 1, 1], [], []>} : vector<8x8xbf16>, vector<8x256xbf16>, vector<8x256xf32> -> vector<8x256xf32>
    %67 = arith.addf %57, %66 : vector<8x256xf32>
    %c240_i32 = arith.constant 240 : i32
    %68 = tpu.dynamic_rotate %3 by %c240_i32 dim 1 : vector<8x256xf32>, i32 -> vector<8x256xf32>
    %69 = arith.truncf %68 : vector<8x256xf32> to vector<8x256xbf16>
    %c7 = arith.constant 7 : index
    %c0_45 = arith.constant 0 : index
    %c0_46 = arith.constant 0 : index
    %70 = vector.load %arg6[%c7, %c0_45, %c0_46] : memref<9x1x256xbf16, #tpu.memory_space<vmem>>, vector<1x1x256xbf16>
    %71 = vector.shape_cast %70 : vector<1x1x256xbf16> to vector<1x256xbf16>
    %72 = vector.broadcast %71 : vector<1x256xbf16> to vector<8x256xbf16>
    %73 = arith.mulf %69, %72 : vector<8x256xbf16>
    %c7_47 = arith.constant 7 : index
    %c0_48 = arith.constant 0 : index
    %c0_49 = arith.constant 0 : index
    %74 = vector.load %arg2[%c7_47, %c0_48, %c0_49] : memref<9x8x8xbf16, #tpu.memory_space<vmem>>, vector<1x8x8xbf16>
    %75 = vector.shape_cast %74 : vector<1x8x8xbf16> to vector<8x8xbf16>
    %cst_50 = arith.constant dense<0.000000e+00> : vector<8x256xf32>
    %76 = tpu.matmul %75, %73, %cst_50 {dimension_numbers = #tpu.dot_dimension_numbers<[1], [0], [0], [1], [0, 0, 1, 1], [], []>} : vector<8x8xbf16>, vector<8x256xbf16>, vector<8x256xf32> -> vector<8x256xf32>
    %77 = arith.addf %67, %76 : vector<8x256xf32>
    %c239_i32 = arith.constant 239 : i32
    %78 = tpu.dynamic_rotate %3 by %c239_i32 dim 1 : vector<8x256xf32>, i32 -> vector<8x256xf32>
    %79 = arith.truncf %78 : vector<8x256xf32> to vector<8x256xbf16>
    %c8 = arith.constant 8 : index
    %c0_51 = arith.constant 0 : index
    %c0_52 = arith.constant 0 : index
    %80 = vector.load %arg6[%c8, %c0_51, %c0_52] : memref<9x1x256xbf16, #tpu.memory_space<vmem>>, vector<1x1x256xbf16>
    %81 = vector.shape_cast %80 : vector<1x1x256xbf16> to vector<1x256xbf16>
    %82 = vector.broadcast %81 : vector<1x256xbf16> to vector<8x256xbf16>
    %83 = arith.mulf %79, %82 : vector<8x256xbf16>
    %c8_53 = arith.constant 8 : index
    %c0_54 = arith.constant 0 : index
    %c0_55 = arith.constant 0 : index
    %84 = vector.load %arg2[%c8_53, %c0_54, %c0_55] : memref<9x8x8xbf16, #tpu.memory_space<vmem>>, vector<1x8x8xbf16>
    %85 = vector.shape_cast %84 : vector<1x8x8xbf16> to vector<8x8xbf16>
    %cst_56 = arith.constant dense<0.000000e+00> : vector<8x256xf32>
    %86 = tpu.matmul %85, %83, %cst_56 {dimension_numbers = #tpu.dot_dimension_numbers<[1], [0], [0], [1], [0, 0, 1, 1], [], []>} : vector<8x8xbf16>, vector<8x256xbf16>, vector<8x256xf32> -> vector<8x256xf32>
    %87 = arith.addf %77, %86 : vector<8x256xf32>
    %88 = vector.broadcast %0 : vector<8x1xf32> to vector<8x256xf32>
    %89 = arith.addf %87, %88 : vector<8x256xf32>
    %cst_57 = arith.constant 0.000000e+00 : f32
    %90 = vector.broadcast %cst_57 : f32 to vector<8x256xf32>
    %91 = arith.maximumf %89, %90 : vector<8x256xf32>
    %92 = arith.truncf %91 : vector<8x256xf32> to vector<8x256xbf16>
    %c17_i32_58 = arith.constant 17 : i32
    %93 = tpu.dynamic_rotate %91 by %c17_i32_58 dim 1 : vector<8x256xf32>, i32 -> vector<8x256xf32>
    %94 = arith.truncf %93 : vector<8x256xf32> to vector<8x256xbf16>
    %c0_59 = arith.constant 0 : index
    %c0_60 = arith.constant 0 : index
    %c0_61 = arith.constant 0 : index
    %95 = vector.load %arg6[%c0_59, %c0_60, %c0_61] : memref<9x1x256xbf16, #tpu.memory_space<vmem>>, vector<1x1x256xbf16>
    %96 = vector.shape_cast %95 : vector<1x1x256xbf16> to vector<1x256xbf16>
    %97 = vector.broadcast %96 : vector<1x256xbf16> to vector<8x256xbf16>
    %98 = arith.mulf %94, %97 : vector<8x256xbf16>
    %c0_62 = arith.constant 0 : index
    %c0_63 = arith.constant 0 : index
    %c0_64 = arith.constant 0 : index
    %99 = vector.load %arg4[%c0_62, %c0_63, %c0_64] : memref<9x8x8xbf16, #tpu.memory_space<vmem>>, vector<1x8x8xbf16>
    %100 = vector.shape_cast %99 : vector<1x8x8xbf16> to vector<8x8xbf16>
    %cst_65 = arith.constant dense<0.000000e+00> : vector<8x256xf32>
    %101 = tpu.matmul %100, %98, %cst_65 {dimension_numbers = #tpu.dot_dimension_numbers<[1], [0], [0], [1], [0, 0, 1, 1], [], []>} : vector<8x8xbf16>, vector<8x256xbf16>, vector<8x256xf32> -> vector<8x256xf32>
    %c16_i32_66 = arith.constant 16 : i32
    %102 = tpu.dynamic_rotate %91 by %c16_i32_66 dim 1 : vector<8x256xf32>, i32 -> vector<8x256xf32>
    %103 = arith.truncf %102 : vector<8x256xf32> to vector<8x256xbf16>
    %c1_67 = arith.constant 1 : index
    %c0_68 = arith.constant 0 : index
    %c0_69 = arith.constant 0 : index
    %104 = vector.load %arg6[%c1_67, %c0_68, %c0_69] : memref<9x1x256xbf16, #tpu.memory_space<vmem>>, vector<1x1x256xbf16>
    %105 = vector.shape_cast %104 : vector<1x1x256xbf16> to vector<1x256xbf16>
    %106 = vector.broadcast %105 : vector<1x256xbf16> to vector<8x256xbf16>
    %107 = arith.mulf %103, %106 : vector<8x256xbf16>
    %c1_70 = arith.constant 1 : index
    %c0_71 = arith.constant 0 : index
    %c0_72 = arith.constant 0 : index
    %108 = vector.load %arg4[%c1_70, %c0_71, %c0_72] : memref<9x8x8xbf16, #tpu.memory_space<vmem>>, vector<1x8x8xbf16>
    %109 = vector.shape_cast %108 : vector<1x8x8xbf16> to vector<8x8xbf16>
    %cst_73 = arith.constant dense<0.000000e+00> : vector<8x256xf32>
    %110 = tpu.matmul %109, %107, %cst_73 {dimension_numbers = #tpu.dot_dimension_numbers<[1], [0], [0], [1], [0, 0, 1, 1], [], []>} : vector<8x8xbf16>, vector<8x256xbf16>, vector<8x256xf32> -> vector<8x256xf32>
    %111 = arith.addf %101, %110 : vector<8x256xf32>
    %c15_i32_74 = arith.constant 15 : i32
    %112 = tpu.dynamic_rotate %91 by %c15_i32_74 dim 1 : vector<8x256xf32>, i32 -> vector<8x256xf32>
    %113 = arith.truncf %112 : vector<8x256xf32> to vector<8x256xbf16>
    %c2_75 = arith.constant 2 : index
    %c0_76 = arith.constant 0 : index
    %c0_77 = arith.constant 0 : index
    %114 = vector.load %arg6[%c2_75, %c0_76, %c0_77] : memref<9x1x256xbf16, #tpu.memory_space<vmem>>, vector<1x1x256xbf16>
    %115 = vector.shape_cast %114 : vector<1x1x256xbf16> to vector<1x256xbf16>
    %116 = vector.broadcast %115 : vector<1x256xbf16> to vector<8x256xbf16>
    %117 = arith.mulf %113, %116 : vector<8x256xbf16>
    %c2_78 = arith.constant 2 : index
    %c0_79 = arith.constant 0 : index
    %c0_80 = arith.constant 0 : index
    %118 = vector.load %arg4[%c2_78, %c0_79, %c0_80] : memref<9x8x8xbf16, #tpu.memory_space<vmem>>, vector<1x8x8xbf16>
    %119 = vector.shape_cast %118 : vector<1x8x8xbf16> to vector<8x8xbf16>
    %cst_81 = arith.constant dense<0.000000e+00> : vector<8x256xf32>
    %120 = tpu.matmul %119, %117, %cst_81 {dimension_numbers = #tpu.dot_dimension_numbers<[1], [0], [0], [1], [0, 0, 1, 1], [], []>} : vector<8x8xbf16>, vector<8x256xbf16>, vector<8x256xf32> -> vector<8x256xf32>
    %121 = arith.addf %111, %120 : vector<8x256xf32>
    %c1_i32_82 = arith.constant 1 : i32
    %122 = tpu.dynamic_rotate %91 by %c1_i32_82 dim 1 : vector<8x256xf32>, i32 -> vector<8x256xf32>
    %123 = arith.truncf %122 : vector<8x256xf32> to vector<8x256xbf16>
    %c3_83 = arith.constant 3 : index
    %c0_84 = arith.constant 0 : index
    %c0_85 = arith.constant 0 : index
    %124 = vector.load %arg6[%c3_83, %c0_84, %c0_85] : memref<9x1x256xbf16, #tpu.memory_space<vmem>>, vector<1x1x256xbf16>
    %125 = vector.shape_cast %124 : vector<1x1x256xbf16> to vector<1x256xbf16>
    %126 = vector.broadcast %125 : vector<1x256xbf16> to vector<8x256xbf16>
    %127 = arith.mulf %123, %126 : vector<8x256xbf16>
    %c3_86 = arith.constant 3 : index
    %c0_87 = arith.constant 0 : index
    %c0_88 = arith.constant 0 : index
    %128 = vector.load %arg4[%c3_86, %c0_87, %c0_88] : memref<9x8x8xbf16, #tpu.memory_space<vmem>>, vector<1x8x8xbf16>
    %129 = vector.shape_cast %128 : vector<1x8x8xbf16> to vector<8x8xbf16>
    %cst_89 = arith.constant dense<0.000000e+00> : vector<8x256xf32>
    %130 = tpu.matmul %129, %127, %cst_89 {dimension_numbers = #tpu.dot_dimension_numbers<[1], [0], [0], [1], [0, 0, 1, 1], [], []>} : vector<8x8xbf16>, vector<8x256xbf16>, vector<8x256xf32> -> vector<8x256xf32>
    %131 = arith.addf %121, %130 : vector<8x256xf32>
    %c4_90 = arith.constant 4 : index
    %c0_91 = arith.constant 0 : index
    %c0_92 = arith.constant 0 : index
    %132 = vector.load %arg4[%c4_90, %c0_91, %c0_92] : memref<9x8x8xbf16, #tpu.memory_space<vmem>>, vector<1x8x8xbf16>
    %133 = vector.shape_cast %132 : vector<1x8x8xbf16> to vector<8x8xbf16>
    %cst_93 = arith.constant dense<0.000000e+00> : vector<8x256xf32>
    %134 = tpu.matmul %133, %92, %cst_93 {dimension_numbers = #tpu.dot_dimension_numbers<[1], [0], [0], [1], [0, 0, 1, 1], [], []>} : vector<8x8xbf16>, vector<8x256xbf16>, vector<8x256xf32> -> vector<8x256xf32>
    %135 = arith.addf %131, %134 : vector<8x256xf32>
    %c255_i32_94 = arith.constant 255 : i32
    %136 = tpu.dynamic_rotate %91 by %c255_i32_94 dim 1 : vector<8x256xf32>, i32 -> vector<8x256xf32>
    %137 = arith.truncf %136 : vector<8x256xf32> to vector<8x256xbf16>
    %c5_95 = arith.constant 5 : index
    %c0_96 = arith.constant 0 : index
    %c0_97 = arith.constant 0 : index
    %138 = vector.load %arg6[%c5_95, %c0_96, %c0_97] : memref<9x1x256xbf16, #tpu.memory_space<vmem>>, vector<1x1x256xbf16>
    %139 = vector.shape_cast %138 : vector<1x1x256xbf16> to vector<1x256xbf16>
    %140 = vector.broadcast %139 : vector<1x256xbf16> to vector<8x256xbf16>
    %141 = arith.mulf %137, %140 : vector<8x256xbf16>
    %c5_98 = arith.constant 5 : index
    %c0_99 = arith.constant 0 : index
    %c0_100 = arith.constant 0 : index
    %142 = vector.load %arg4[%c5_98, %c0_99, %c0_100] : memref<9x8x8xbf16, #tpu.memory_space<vmem>>, vector<1x8x8xbf16>
    %143 = vector.shape_cast %142 : vector<1x8x8xbf16> to vector<8x8xbf16>
    %cst_101 = arith.constant dense<0.000000e+00> : vector<8x256xf32>
    %144 = tpu.matmul %143, %141, %cst_101 {dimension_numbers = #tpu.dot_dimension_numbers<[1], [0], [0], [1], [0, 0, 1, 1], [], []>} : vector<8x8xbf16>, vector<8x256xbf16>, vector<8x256xf32> -> vector<8x256xf32>
    %145 = arith.addf %135, %144 : vector<8x256xf32>
    %c241_i32_102 = arith.constant 241 : i32
    %146 = tpu.dynamic_rotate %91 by %c241_i32_102 dim 1 : vector<8x256xf32>, i32 -> vector<8x256xf32>
    %147 = arith.truncf %146 : vector<8x256xf32> to vector<8x256xbf16>
    %c6_103 = arith.constant 6 : index
    %c0_104 = arith.constant 0 : index
    %c0_105 = arith.constant 0 : index
    %148 = vector.load %arg6[%c6_103, %c0_104, %c0_105] : memref<9x1x256xbf16, #tpu.memory_space<vmem>>, vector<1x1x256xbf16>
    %149 = vector.shape_cast %148 : vector<1x1x256xbf16> to vector<1x256xbf16>
    %150 = vector.broadcast %149 : vector<1x256xbf16> to vector<8x256xbf16>
    %151 = arith.mulf %147, %150 : vector<8x256xbf16>
    %c6_106 = arith.constant 6 : index
    %c0_107 = arith.constant 0 : index
    %c0_108 = arith.constant 0 : index
    %152 = vector.load %arg4[%c6_106, %c0_107, %c0_108] : memref<9x8x8xbf16, #tpu.memory_space<vmem>>, vector<1x8x8xbf16>
    %153 = vector.shape_cast %152 : vector<1x8x8xbf16> to vector<8x8xbf16>
    %cst_109 = arith.constant dense<0.000000e+00> : vector<8x256xf32>
    %154 = tpu.matmul %153, %151, %cst_109 {dimension_numbers = #tpu.dot_dimension_numbers<[1], [0], [0], [1], [0, 0, 1, 1], [], []>} : vector<8x8xbf16>, vector<8x256xbf16>, vector<8x256xf32> -> vector<8x256xf32>
    %155 = arith.addf %145, %154 : vector<8x256xf32>
    %c240_i32_110 = arith.constant 240 : i32
    %156 = tpu.dynamic_rotate %91 by %c240_i32_110 dim 1 : vector<8x256xf32>, i32 -> vector<8x256xf32>
    %157 = arith.truncf %156 : vector<8x256xf32> to vector<8x256xbf16>
    %c7_111 = arith.constant 7 : index
    %c0_112 = arith.constant 0 : index
    %c0_113 = arith.constant 0 : index
    %158 = vector.load %arg6[%c7_111, %c0_112, %c0_113] : memref<9x1x256xbf16, #tpu.memory_space<vmem>>, vector<1x1x256xbf16>
    %159 = vector.shape_cast %158 : vector<1x1x256xbf16> to vector<1x256xbf16>
    %160 = vector.broadcast %159 : vector<1x256xbf16> to vector<8x256xbf16>
    %161 = arith.mulf %157, %160 : vector<8x256xbf16>
    %c7_114 = arith.constant 7 : index
    %c0_115 = arith.constant 0 : index
    %c0_116 = arith.constant 0 : index
    %162 = vector.load %arg4[%c7_114, %c0_115, %c0_116] : memref<9x8x8xbf16, #tpu.memory_space<vmem>>, vector<1x8x8xbf16>
    %163 = vector.shape_cast %162 : vector<1x8x8xbf16> to vector<8x8xbf16>
    %cst_117 = arith.constant dense<0.000000e+00> : vector<8x256xf32>
    %164 = tpu.matmul %163, %161, %cst_117 {dimension_numbers = #tpu.dot_dimension_numbers<[1], [0], [0], [1], [0, 0, 1, 1], [], []>} : vector<8x8xbf16>, vector<8x256xbf16>, vector<8x256xf32> -> vector<8x256xf32>
    %165 = arith.addf %155, %164 : vector<8x256xf32>
    %c239_i32_118 = arith.constant 239 : i32
    %166 = tpu.dynamic_rotate %91 by %c239_i32_118 dim 1 : vector<8x256xf32>, i32 -> vector<8x256xf32>
    %167 = arith.truncf %166 : vector<8x256xf32> to vector<8x256xbf16>
    %c8_119 = arith.constant 8 : index
    %c0_120 = arith.constant 0 : index
    %c0_121 = arith.constant 0 : index
    %168 = vector.load %arg6[%c8_119, %c0_120, %c0_121] : memref<9x1x256xbf16, #tpu.memory_space<vmem>>, vector<1x1x256xbf16>
    %169 = vector.shape_cast %168 : vector<1x1x256xbf16> to vector<1x256xbf16>
    %170 = vector.broadcast %169 : vector<1x256xbf16> to vector<8x256xbf16>
    %171 = arith.mulf %167, %170 : vector<8x256xbf16>
    %c8_122 = arith.constant 8 : index
    %c0_123 = arith.constant 0 : index
    %c0_124 = arith.constant 0 : index
    %172 = vector.load %arg4[%c8_122, %c0_123, %c0_124] : memref<9x8x8xbf16, #tpu.memory_space<vmem>>, vector<1x8x8xbf16>
    %173 = vector.shape_cast %172 : vector<1x8x8xbf16> to vector<8x8xbf16>
    %cst_125 = arith.constant dense<0.000000e+00> : vector<8x256xf32>
    %174 = tpu.matmul %173, %171, %cst_125 {dimension_numbers = #tpu.dot_dimension_numbers<[1], [0], [0], [1], [0, 0, 1, 1], [], []>} : vector<8x8xbf16>, vector<8x256xbf16>, vector<8x256xf32> -> vector<8x256xf32>
    %175 = arith.addf %165, %174 : vector<8x256xf32>
    %176 = vector.broadcast %1 : vector<8x1xf32> to vector<8x256xf32>
    %177 = arith.addf %175, %176 : vector<8x256xf32>
    %178 = arith.addf %177, %3 : vector<8x256xf32>
    %c0_126 = arith.constant 0 : index
    %c0_127 = arith.constant 0 : index
    %c0_128 = arith.constant 0 : index
    %179 = vector.load %arg7[%c0_126, %c0_127, %c0_128] : memref<1x8x256xf32, #tpu.memory_space<vmem>>, vector<1x8x256xf32>
    %180 = vector.shape_cast %179 : vector<1x8x256xf32> to vector<8x256xf32>
    %181 = vector.shape_cast %178 : vector<8x256xf32> to vector<1x8x256xf32>
    tpu.vector_store %arg7[%c0_126, %c0_127, %c0_128], %181 {strides = array<i32>} : memref<1x8x256xf32, #tpu.memory_space<vmem>>, vector<1x8x256xf32>,
    return
  }
  func.func @transform_0(%arg0: i32) -> (i32, i32, i32) {
    %c0_i32 = arith.constant 0 : i32
    %c0_i32_0 = arith.constant 0 : i32
    %c0_i32_1 = arith.constant 0 : i32
    return %arg0, %c0_i32, %c0_i32_0 : i32, i32, i32
  }
  func.func @transform_1(%arg0: i32) -> (i32, i32, i32) {
    %c0_i32 = arith.constant 0 : i32
    %c0_i32_0 = arith.constant 0 : i32
    %c0_i32_1 = arith.constant 0 : i32
    %c0_i32_2 = arith.constant 0 : i32
    return %c0_i32, %c0_i32_0, %c0_i32_1 : i32, i32, i32
  }
  func.func @transform_2(%arg0: i32) -> (i32, i32) {
    %c0_i32 = arith.constant 0 : i32
    %c0_i32_0 = arith.constant 0 : i32
    %c0_i32_1 = arith.constant 0 : i32
    return %c0_i32, %c0_i32_0 : i32, i32
  }
  func.func @transform_3(%arg0: i32) -> (i32, i32, i32) {
    %c0_i32 = arith.constant 0 : i32
    %c0_i32_0 = arith.constant 0 : i32
    %c0_i32_1 = arith.constant 0 : i32
    %c0_i32_2 = arith.constant 0 : i32
    return %c0_i32, %c0_i32_0, %c0_i32_1 : i32, i32, i32
  }
  func.func @transform_4(%arg0: i32) -> (i32, i32) {
    %c0_i32 = arith.constant 0 : i32
    %c0_i32_0 = arith.constant 0 : i32
    %c0_i32_1 = arith.constant 0 : i32
    return %c0_i32, %c0_i32_0 : i32, i32
  }
  func.func @transform_5(%arg0: i32) -> (i32, i32, i32) {
    %c0_i32 = arith.constant 0 : i32
    %c0_i32_0 = arith.constant 0 : i32
    %c0_i32_1 = arith.constant 0 : i32
    %c0_i32_2 = arith.constant 0 : i32
    return %c0_i32, %c0_i32_0, %c0_i32_1 : i32, i32, i32
  }
  func.func @transform_6(%arg0: i32) -> (i32, i32, i32) {
    %c0_i32 = arith.constant 0 : i32
    %c0_i32_0 = arith.constant 0 : i32
    %c0_i32_1 = arith.constant 0 : i32
    return %arg0, %c0_i32, %c0_i32_0 : i32, i32, i32
  }
}

</mosaic_0001>

<bundles_post_ra>
// kernel: basic_block_forward.1
= control target key start
LH: loop header
LB: loop body
LE: loop exit
PB: predicated region body
PF: predicated region fallthrough
CT: control target
= control target key end

     0   :  { %s2013_s21 = smov 0   ;;  %s2436_s0 = inlined_call_operand.vmem [shape: f32[2,8,256], index: 0, kind: input, shape index: {}]   ;;  %s2437_s1 = inlined_call_operand.vmem [shape: bf16[9,8,8], index: 1, kind: input, shape index: {}]   ;;  %s2438_s2 = inlined_call_operand.vmem [shape: f32[8,1], index: 2, kind: input, shape index: {}]   ;;  %s2439_s3 = inlined_call_operand.vmem [shape: bf16[9,8,8], index: 3, kind: input, shape index: {}]   ;;  %s2440_s4 = inlined_call_operand.vmem [shape: f32[8,1], index: 4, kind: input, shape index: {}]   ;;  %s2441_s5 = inlined_call_operand.vmem [shape: bf16[9,1,256], index: 5, kind: input, shape index: {}]   ;;  %s2442_s6 = inlined_call_operand.vmem [shape: f32[2,8,256], index: 6, kind: output, shape index: {}]  }
   0x1 LB: > { %s1781_s22 = sadd.s32 4294967295, %s1966_s21   ;;  %p1785_p0 = scmp.ge.s32.totalorder %s1966_s21, 1  ;;  %s1966_s21 = sphi %s2013_s21, %s16_s21  }
   0x2   : > { %p212_p1 = scmp.lt.s32.totalorder %s1966_s21, 3 }
   0x4   : > { %p213_p2 = pnand %p1785_p0, %p212_p1 }
   0x5   : > { %p242_p3 = scmp.lt.s32.totalorder (!%p213_p2), %s1781_s22, 1  ;;  %v1968_v0 = vmov (!%p213_p2), 0   ;;  %s1969_s27 = smov (!%p213_p2), 16   ;;  %v253_v4 = vld [vmem:[%s2438_s2] sm:$0xff] (!%p213_p2)  ;;  %v263_v5 = vlaneseq (!%p213_p2)  ;;  %v1977_v6 = vmov (!%p213_p2), 1966171168  }
   0x6   : > { %216 = sbr.rel (%p213_p2) target bundleno = 776 (0x308), region = 44  ;;  %406 = vmatprep.mubr.bf16.mxu0 (!%p213_p2), %v1968_v0  ;;  %456 = vmatprep.mubr.bf16.mxu1 (!%p213_p2), %v1968_v0  ;;  %s1970_s28 = smov (!%p213_p2), 15   ;;  %v281_v7 = vunpack.c.l.s4 (!%p213_p2), %v1977_v6  ;;  %v1792_v10 = vld.sshfl [vmem:[%s2441_s5 + $0x2] sm:$0x11 pattern:$0x75316420] (!%p213_p2) }
   0x7   : > { %1919 = vset.pattern.permute.xlu0 (!%p213_p2), %v1968_v0  ;;  %s1971_s29 = smov (!%p213_p2), 17   ;;  %s1972_s30 = smov (!%p213_p2), 1   ;;  %v284_v9 = vshrl.u32 (!%p213_p2), %v263_v5, 7  ;;  %v330_v15 = vcombine.high (!%p213_p2), %v1792_v10, %v1792_v10  ;;  %v2071_v26 = vand.u32 (!%p213_p2), 127, %v263_v5  ;;  %vm367_vm3 = vcmask (!%p213_p2), 1043456  }
   0x8   : > { %s1973_s7 = smov (!%p213_p2), 127   ;;  %s1974_s8 = smov (!%p213_p2), 113   ;;  %v282_v8 = vunpack.c.0.s8 (!%p213_p2), %v281_v7  ;;  %v1790_v11 = vld.sshfl [vmem:[%s2441_s5] sm:$0x11 pattern:$0x75316420] (!%p213_p2) }
   0x9   : > { %s1975_s9 = smov (!%p213_p2), 112   ;;  %s1976_s10 = smov (!%p213_p2), 111   ;;  %v1799_v12 = vld.sshfl [vmem:[%s2441_s5 + $0x4] sm:$0x11 pattern:$0x75316420] (!%p213_p2)  ;;  %v279_v16 = vcombine.high (!%p213_p2), %v1790_v11, %v1790_v11 }
   0xa   : > { %v1804_v13 = vld.sshfl [vmem:[%s2441_s5 + $0x6] sm:$0x11 pattern:$0x75316420] (!%p213_p2)  ;;  %v2061_v14 = vsub.s32 (!%p213_p2), %v282_v8, %v284_v9  ;;  %v484_v18 = vcombine.high (!%p213_p2), %v1799_v12, %v1799_v12  ;;  %v2081_v33 = vsub.s32 (!%p213_p2), 0, %v284_v9  ;;  %vm469_vm0 = vcmp.lt.s32.totalorder (!%p213_p2), %v2071_v26, 15 }
   0xb   : > { %v1812_v17 = vld.sshfl [vmem:[%s2441_s5 + $0xa] sm:$0x11 pattern:$0x75316420] (!%p213_p2)  ;;  %v588_v19 = vcombine.high (!%p213_p2), %v1804_v13, %v1804_v13  ;;  %vm315_vm1 = vcmp.lt.s32.totalorder (!%p213_p2), %v2071_v26, 16  ;;  %vm573_vm2 = vcmp.lt.s32.totalorder (!%p213_p2), %v2071_v26, 1 }
   0xc   : > { %v746_v20 = vcombine.high (!%p213_p2), %v1812_v17, %v1812_v17  ;;  %v344_v21 = vrot.slane (!%p213_p2), %v330_v15, %v2061_v14  ;;  %v337_v22 = vrot.slane (!%p213_p2), %v1792_v10, %v2061_v14  ;;  %v293_v23 = vrot.slane (!%p213_p2), %v279_v16, %v2061_v14  ;;  %v1817_v30 = vld.sshfl [vmem:[%s2441_s5 + $0xc] sm:$0x11 pattern:$0x75316420] (!%p213_p2) }
   0xd   : > { %s2444_s22 = smov (!%p242_p3, %s1781_s22), 1  ;;  %v286_v24 = vrot.slane %v1790_v11, %v2061_v14  ;;  %v491_v25 = vrot.slane %v1799_v12, %v2061_v14  ;;  %v498_v27 = vrot.slane %v484_v18, %v2061_v14  ;;  %v602_v28 = vrot.slane %v588_v19, %v2061_v14  ;;  %v1822_v43 = vld.sshfl [vmem:[%s2441_s5 + $0xe] sm:$0x11 pattern:$0x75316420] }
   0xe   : > { %s1859_s23 = sshll.u32 %s2444_s22, 4  ;;  %v595_v29 = vrot.slane %v1804_v13, %v2061_v14  ;;  %v760_v31 = vrot.slane %v746_v20, %v2061_v14  ;;  %v753_v32 = vrot.slane %v1812_v17, %v2061_v14  ;;  %v353_v34 = vpack.i.b16 %v344_v21, %v344_v21  ;;  %v2125_v58 = vld.sshfl [vmem:[%s2441_s5 + $0x10] sm:$0x11 pattern:$0x75316420] }
   0xf   : > { %s246_s26 = scalar_lea.vmem %s2436_s0, %s1859_s23  ;;  %v346_v35 = vpack.i.b16 %v337_v22, %v337_v22  ;;  %v302_v36 = vpack.i.b16 %v293_v23, %v293_v23  ;;  %v295_v37 = vpack.i.b16 %v286_v24, %v286_v24  ;;  %v500_v38 = vpack.i.b16 %v491_v25, %v491_v25  ;;  %s251_s25 = scalar_lea.vmem %s2442_s6, %s1859_s23 }
  0x10   : > { %v2031_v1 = vld [vmem:[%s246_s26] sm:$0xff]  ;;  %v2033_v2 = vld [vmem:[%s246_s26 + $0x8] sm:$0xff]  ;;  %v850_v39 = vcombine.high %v1817_v30, %v1817_v30  ;;  %v507_v40 = vpack.i.b16 %v498_v27, %v498_v27  ;;  %v611_v41 = vpack.i.b16 %v602_v28, %v602_v28  ;;  %v604_v42 = vpack.i.b16 %v595_v29, %v595_v29 }
  0x11   : > { %v1879_v3 = vpack.i.bf16 %v2033_v2, %v2031_v1  ;;  %v769_v44 = vpack.i.b16 %v760_v31, %v760_v31  ;;  %v762_v45 = vpack.i.b16 %v753_v32, %v753_v32  ;;  %v2090_v46 = vrot.slane %v1817_v30, %v2061_v14 }
  0x12   : > { %v2093_v47 = vrot.slane %v353_v34, %v2081_v33  ;;  %v2096_v48 = vrot.slane %v346_v35, %v2081_v33  ;;  %vm265_vm4 = vcmp.lt.s32.totalorder %v2071_v26, 17  ;;  %v2100_v49 = vrot.slane %v302_v36, %v2081_v33 }
  0x13   : > { %1880 = vrot.lane.b32.xlu0 %v1879_v3, %s1969_s27  ;;  %1890 = vrot.lane.b32.xlu1 %v1879_v3, %s1970_s28  ;;  %v2103_v50 = vrot.slane %v295_v37, %v2081_v33  ;;  %v2106_v51 = vrot.slane %v500_v38, %v2081_v33  ;;  %v2109_v52 = vrot.slane %v850_v39, %v2061_v14  ;;  %vm731_vm5 = vcmp.lt.s32.totalorder %v2071_v26, 127 }
  0x14   : > { %v954_v53 = vcombine.high %v1822_v43, %v1822_v43  ;;  %v2112_v54 = vrot.slane %v507_v40, %v2081_v33  ;;  %v2115_v55 = vrot.slane %v611_v41, %v2081_v33  ;;  %v2118_v56 = vrot.slane %v604_v42, %v2081_v33 }
  0x15   : > { %v258_v57 = vpack.c.bf16 %v2033_v2, %v2033_v2  ;;  %v257_v61 = vpack.c.bf16 %v2031_v1, %v2031_v1  ;;  %v2131_v62 = vrot.slane %v769_v44, %v2081_v33  ;;  %v2134_v63 = vrot.slane %v762_v45, %v2081_v33 }
  0x16   : > { %vm363_vm6 = vcmask 64512   ;;  %vm835_vm7 = vcmp.lt.s32.totalorder %v2071_v26, 113  ;;  %v873_v8 = vpack.i.b16 %v2109_v52, %v2109_v52  ;;  %v2142_v9 = vrot.slane %v954_v53, %v2061_v14 }
  0x17   : > { %1885 = vrot.lane.b32.xlu0 %v1879_v3, %s1971_s29  ;;  %1895 = vrot.lane.b32.xlu1 %v1879_v3, %s1972_s30  ;;  %v2145_v10 = vrot.slane %v1822_v43, %v2061_v14  ;;  %v1058_v11 = vcombine.high %v2125_v58, %v2125_v58  ;;  %v1793_v43 = vld [vmem:[%s2437_s1 + $0x4] sm:$0xf]  ;;  %vm939_vm8 = vcmp.lt.s32.totalorder %v2071_v26, 112  ;;  %vm1043_vm9 = vcmp.lt.s32.totalorder %v2071_v26, 111  ;;  %v1845_v26 = vld [vmem:[%s2439_s3 + $0x14] sm:$0xf] }
  0x1b   : > { %1900 = vrot.lane.b32.xlu0 %v1879_v3, %s1973_s7  ;;  %1905 = vrot.lane.b32.xlu1 %v1879_v3, %s1974_s8 }
  0x1f   : > { %1910 = vrot.lane.b32.xlu0 %v1879_v3, %s1975_s9  ;;  %1915 = vrot.lane.b32.xlu1 %v1879_v3, %s1976_s10  ;;  %v866_v3 = vpack.i.b16 %v2090_v46, %v2090_v46 }
  0x23   : > { %1145 = vperm.xlu0 %1919, %v253_v4  }
  0x85   : > { %v1881_v59 = vpop.permute.xlu0 %1880  ;;  %v1891_v60 = vpop.permute.xlu1 %1890 }
  0x86   : > { %v1883_v4 = vunpack.i.h.bf16 %v1881_v59  ;;  %v1882_v5 = vunpack.i.l.bf16 %v1881_v59  ;;  %v1893_v6 = vunpack.i.h.bf16 %v1891_v60  ;;  %v1892_v7 = vunpack.i.l.bf16 %v1891_v60 }
  0x88   : > { %v470_v12 = vsel %vm469_vm0, %v1892_v7, %v1893_v6  ;;  %v471_v13 = vsel %vm469_vm0, %v1893_v6, %v1892_v7  ;;  %v316_v15 = vsel %vm315_vm1, %v1882_v5, %v1883_v4  ;;  %v317_v16 = vsel %vm315_vm1, %v1883_v4, %v1882_v5 }
  0x89   : > { %v1886_v17 = vpop.permute.xlu0 %1885  ;;  %v472_v18 = vpack.c.bf16 %v471_v13, %v471_v13  ;;  %v473_v19 = vpack.c.bf16 %v470_v12, %v470_v12  ;;  %v319_v20 = vpack.c.bf16 %v316_v15, %v316_v15  ;;  %v318_v21 = vpack.c.bf16 %v317_v16, %v317_v16  ;;  %v1896_v22 = vpop.permute.xlu1 %1895 }
  0x8a   : > { %v1888_v23 = vunpack.i.h.bf16 %v1886_v17  ;;  %v1887_v24 = vunpack.i.l.bf16 %v1886_v17  ;;  %v1898_v25 = vunpack.i.h.bf16 %v1896_v22  ;;  %v1897_v27 = vunpack.i.l.bf16 %v1896_v22 }
  0x8b   : > { %v360_v28 = vmul.bf16 %v2093_v47, %v319_v20  ;;  %v359_v29 = vmul.bf16 %v2096_v48, %v318_v21  ;;  %v514_v30 = vmul.bf16 %v2112_v54, %v473_v19  ;;  %v513_v31 = vmul.bf16 %v2106_v51, %v472_v18 }
  0x8c   : > { %v574_v32 = vsel %vm573_vm2, %v1897_v27, %v1898_v25  ;;  %v575_v34 = vsel %vm573_vm2, %v1898_v25, %v1897_v27  ;;  %v266_v35 = vsel %vm265_vm4, %v1887_v24, %v1888_v23  ;;  %v267_v36 = vsel %vm265_vm4, %v1888_v23, %v1887_v24 }
  0x8d   : > { %1794 = vmatprep.subr.msk.bf16.mxu0 %vm367_vm3, %v360_v28  ;;  %v369_v37 = vsel %vm367_vm3, %v359_v29, 0  ;;  %v576_v38 = vpack.c.bf16 %v575_v34, %v575_v34  ;;  %v577_v39 = vpack.c.bf16 %v574_v32, %v574_v32  ;;  %v269_v40 = vpack.c.bf16 %v266_v35, %v266_v35  ;;  %v1901_v41 = vpop.permute.xlu0 %1900  ;;  %v1906_v42 = vpop.permute.xlu1 %1905 }
  0x8e   : > { %375 = vmatpush1.bf16.msra.mxu0 %v369_v37  ;;  %v268_v44 = vpack.c.bf16 %v267_v36, %v267_v36  ;;  %v521_v45 = vsel %vm367_vm3, %v513_v31, 0  ;;  %v1903_v52 = vunpack.i.h.bf16 %v1901_v41  ;;  %v1902_v53 = vunpack.i.l.bf16 %v1901_v41 }
  0x8f   : > { %v309_v59 = vmul.bf16 %v2100_v49, %v269_v40  ;;  %1801 = vmatprep.subr.msk.bf16.mxu0 %vm367_vm3, %v514_v30  ;;  %v618_v60 = vmul.bf16 %v2115_v55, %v577_v39  ;;  %v617_v4 = vmul.bf16 %v2118_v56, %v576_v38  ;;  %v1908_v5 = vunpack.i.h.bf16 %v1906_v42  ;;  %v1805_v40 = vld [vmem:[%s2437_s1 + $0xc] sm:$0xf] }
  0x90   : > { %v308_v6 = vmul.bf16 %v2103_v50, %v268_v44  ;;  %v732_v7 = vsel %vm731_vm5, %v1902_v53, %v1903_v52  ;;  %v733_v12 = vsel %vm731_vm5, %v1903_v52, %v1902_v53  ;;  %v1907_v13 = vunpack.i.l.bf16 %v1906_v42 }
  0x91   : > { %1795 = vmatmul.mubr.msk.bf16.vlgmr.msra.gmra.mrb[0].mxu0 %vm363_vm6, %v1793_v43  ;;  %1796 = vmatprep.subr.msk.bf16.mxu1 %vm367_vm3, %v309_v59  ;;  %v735_v15 = vpack.c.bf16 %v733_v12, %v733_v12  ;;  %v1911_v16 = vpop.permute.xlu0 %1910  ;;  %v1916_v17 = vpop.permute.xlu1 %1915  ;;  %v2188_v18 = vrot.slane %v873_v8, %v2081_v33  ;;  %v977_v19 = vpack.i.b16 %v2142_v9, %v2142_v9  ;;  %v310_v8 = vld [vmem:[%s2437_s1] sm:$0xf]  ;;  %v625_v25 = vsel %vm367_vm3, %v617_v4, 0 }
  0x92   : > { %v419_v20 = vsel %vm367_vm3, %v308_v6, 0  ;;  %527 = vmatpush1.bf16.msra.mxu0 %v521_v45  ;;  %558 = vmatprep.mubr.bf16.mxu0 %v1968_v0  ;;  %v837_v21 = vsel %vm835_vm7, %v1908_v5, %v1907_v13  ;;  %v1913_v22 = vunpack.i.h.bf16 %v1911_v16  ;;  %v1072_v23 = vrot.slane %v1058_v11, %v2061_v14 }
  0x93   : > { %425 = vmatpush1.bf16.msra.mxu1 %v419_v20  ;;  %v734_v24 = vpack.c.bf16 %v732_v7, %v732_v7  ;;  %v839_v9 = vpack.c.bf16 %v837_v21, %v837_v21  ;;  %1809 = vmatprep.subr.msk.bf16.mxu0 %vm367_vm3, %v258_v57  ;;  %v1912_v27 = vunpack.i.l.bf16 %v1911_v16  ;;  %v836_v11 = vsel %vm835_vm7, %v1907_v13, %v1908_v5  ;;  %v1800_v57 = vld [vmem:[%s2437_s1 + $0x8] sm:$0xf]  ;;  %v1813_v13 = vld [vmem:[%s2437_s1 + $0x14] sm:$0xf]  ;;  %v1818_v16 = vld [vmem:[%s2437_s1 + $0x18] sm:$0xf] }
  0x94   : > { %1806 = vmatprep.subr.msk.bf16.mxu1 %vm367_vm3, %v618_v60  ;;  %v776_v28 = vmul.bf16 %v2131_v62, %v735_v15  ;;  %v1918_v29 = vunpack.i.h.bf16 %v1916_v17  ;;  %v1917_v30 = vunpack.i.l.bf16 %v1916_v17  ;;  %v2220_v32 = vrot.slane %v866_v3, %v2081_v33  ;;  %v1808_v60 = vld [vmem:[%s2437_s1 + $0x10] sm:$0xf]  ;;  %v1828_v20 = vld [vmem:[%s2437_s1 + $0x20] sm:$0xf] }
  0x95   : > { %v941_v31 = vsel %vm939_vm8, %v1913_v22, %v1912_v27  ;;  %v970_v34 = vpack.i.b16 %v2145_v10, %v2145_v10  ;;  %v1065_v35 = vrot.slane %v2125_v58, %v2061_v14  ;;  %v838_v36 = vpack.c.bf16 %v836_v11, %v836_v11 }
  0x96   : > { %1797 = vmatmul.mubr.msk.bf16.vlgmr.msra.gmra.mrb[0].mxu1 %vm363_vm6, %v310_v8  ;;  %v679_v37 = vsel %vm367_vm3, %v257_v61, 0  ;;  %v880_v38 = vmul.bf16 %v2188_v18, %v839_v9  ;;  %v1081_v46 = vpack.i.b16 %v1072_v23, %v1072_v23  ;;  %v943_v3 = vpack.c.bf16 %v941_v31, %v941_v31 }
  0x97   : > { %631 = vmatpush1.bf16.msra.mxu1 %v625_v25  ;;  %662 = vmatprep.mubr.bf16.mxu1 %v1968_v0  ;;  %v775_v10 = vmul.bf16 %v2134_v63, %v734_v24  ;;  %v1045_v14 = vsel %vm1043_vm9, %v1918_v29, %v1917_v30  ;;  %v2237_v58 = vrot.slane %v977_v19, %v2081_v33  ;;  %v1823_v19 = vld [vmem:[%s2437_s1 + $0x1c] sm:$0xf] }
  0x98   : > { %1814 = vmatprep.subr.msk.bf16.mxu1 %vm367_vm3, %v776_v28  ;;  %v940_v39 = vsel %vm939_vm8, %v1912_v27, %v1913_v22  ;;  %v2244_v61 = vrot.slane %v970_v34, %v2081_v33  ;;  %v1047_v41 = vpack.c.bf16 %v1045_v14, %v1045_v14  ;;  %v879_v42 = vmul.bf16 %v2220_v32, %v838_v36 }
  0x99   : > { %1802 = vmatmul.mubr.msk.bf16.vlgmr.msra.gmra.mrb[4].mxu0 %vm363_vm6, %v1800_v57  ;;  %v2252_v43 = vrot.slane %v1081_v46, %v2081_v33  ;;  %v1074_v44 = vpack.i.b16 %v1065_v35, %v1065_v35  ;;  %v942_v45 = vpack.c.bf16 %v940_v39, %v940_v39  ;;  %v783_v52 = vsel %vm367_vm3, %v775_v10, 0 }
  0x9a   : > { %685 = vmatpush1.bf16.msra.mxu0 %v679_v37  ;;  %716 = vmatprep.mubr.bf16.mxu0 %v1968_v0  ;;  %v1044_v53 = vsel %vm1043_vm9, %v1917_v30, %v1918_v29  ;;  %v984_v59 = vmul.bf16 %v2237_v58, %v943_v3  ;;  %v887_v5 = vsel %vm367_vm3, %v879_v42, 0 }
  0x9b   : > { %1819 = vmatprep.subr.msk.bf16.mxu0 %vm367_vm3, %v880_v38  ;;  %v1046_v4 = vpack.c.bf16 %v1044_v53, %v1044_v53  ;;  %v1088_v6 = vmul.bf16 %v2252_v43, %v1047_v41  ;;  %v2266_v7 = vrot.slane %v1074_v44, %v2081_v33  ;;  %v983_v12 = vmul.bf16 %v2244_v61, %v942_v45 }
  0x9d   : > { %v1087_v15 = vmul.bf16 %v2266_v7, %v1046_v4  ;;  %v991_v33 = vsel %vm367_vm3, %v983_v12, 0 }
  0x9e   : > { %1807 = vmatmul.mubr.msk.bf16.vlgmr.msra.gmra.mrb[4].mxu1 %vm363_vm6, %v1805_v40 }
  0x9f   : > { %789 = vmatpush1.bf16.msra.mxu1 %v783_v52  ;;  %820 = vmatprep.mubr.bf16.mxu1 %v1968_v0  ;;  %v1095_v17 = vsel %vm367_vm3, %v1087_v15, 0 }
  0xa0   : > { %1824 = vmatprep.subr.msk.bf16.mxu1 %vm367_vm3, %v984_v59 }
  0xa1   : > { %1810 = vmatmul.mubr.msk.bf16.vlgmr.msra.gmra.mrb[8].mxu0 %vm363_vm6, %v1808_v60 }
  0xa2   : > { %893 = vmatpush1.bf16.msra.mxu0 %v887_v5  ;;  %924 = vmatprep.mubr.bf16.mxu0 %v1968_v0 }
  0xa3   : > { %1829 = vmatprep.subr.msk.bf16.mxu0 %vm367_vm3, %v1088_v6 }
  0xa6   : > { %1815 = vmatmul.mubr.msk.bf16.vlgmr.msra.gmra.mrb[8].mxu1 %vm363_vm6, %v1813_v13 }
  0xa7   : > { %997 = vmatpush1.bf16.msra.mxu1 %v991_v33  ;;  %1028 = vmatprep.mubr.bf16.mxu1 %v1968_v0 }
  0xa9   : > { %1820 = vmatmul.mubr.msk.bf16.vlgmr.msra.gmra.mrb[12].mxu0 %vm363_vm6, %v1818_v16 }
  0xaa   : > { %1101 = vmatpush1.bf16.msra.mxu0 %v1095_v17  ;;  %1132 = vmatprep.mubr.bf16.mxu0 %v1968_v0 }
  0xae   : > { %1825 = vmatmul.mubr.msk.bf16.vlgmr.msra.gmra.mrb[12].mxu1 %vm363_vm6, %v1823_v19 }
  0xaf   : > { %1218 = vmatprep.mubr.bf16.mxu1 %v1968_v0 }
  0xb1   : > { %1830 = vmatmul.mubr.msk.bf16.vlgmr.msra.gmra.mrb[16].mxu0 %vm363_vm6, %v1828_v20 }
  0xb2   : > { %1268 = vmatprep.mubr.bf16.mxu0 %v1968_v0 }
 0x164   : > { %v408_v21 = vpop.f32.mrb[0].mxu0 }
 0x165   : > { %v410_v22 = vpop.f32.mrb[1].mxu0 }
 0x166   : > { %v412_v23 = vpop.f32.mrb[2].mxu0 }
 0x167   : > { %v413_v8 = vpop.f32.mrb[3].mxu0 }
 0x169   : > { %v458_v24 = vpop.f32.mrb[0].mxu1 }
 0x16a   : > { %v459_v25 = vadd.f32 %v458_v24, %v408_v21  ;;  %v460_v9 = vpop.f32.mrb[1].mxu1 }
 0x16b   : > { %v461_v27 = vadd.f32 %v460_v9, %v410_v22  ;;  %v462_v11 = vpop.f32.mrb[2].mxu1  ;;  %v1146_v22 = vpop.permute.xlu0 %1145 }
 0x16c   : > { %v463_v28 = vpop.f32.mrb[3].mxu1  ;;  %v560_v29 = vpop.f32.mrb[4].mxu0 }
 0x16d   : > { %v567_v30 = vadd.f32 %v560_v29, %v459_v25  ;;  %v562_v31 = vpop.f32.mrb[5].mxu0 }
 0x16e   : > { %v568_v57 = vadd.f32 %v562_v31, %v461_v27  ;;  %v564_v34 = vpop.f32.mrb[6].mxu0 }
 0x16f   : > { %v565_v35 = vpop.f32.mrb[7].mxu0  ;;  %v254_v34 = vld [vmem:[%s2440_s4] sm:$0xff] }
 0x171   : > { %v664_v36 = vpop.f32.mrb[4].mxu1 }
 0x172   : > { %v671_v37 = vadd.f32 %v664_v36, %v567_v30  ;;  %v666_v38 = vpop.f32.mrb[5].mxu1 }
 0x173   : > { %v672_v46 = vadd.f32 %v666_v38, %v568_v57  ;;  %v668_v3 = vpop.f32.mrb[6].mxu1 }
 0x174   : > { %v669_v10 = vpop.f32.mrb[7].mxu1  ;;  %v718_v14 = vpop.f32.mrb[8].mxu0 }
 0x175   : > { %v725_v39 = vadd.f32 %v718_v14, %v671_v37  ;;  %v720_v40 = vpop.f32.mrb[9].mxu0 }
 0x176   : > { %v726_v41 = vadd.f32 %v720_v40, %v672_v46  ;;  %v722_v42 = vpop.f32.mrb[10].mxu0 }
 0x177   : > { %v723_v44 = vpop.f32.mrb[11].mxu0 }
 0x179   : > { %v822_v45 = vpop.f32.mrb[8].mxu1 }
 0x17a   : > { %v829_v52 = vadd.f32 %v822_v45, %v725_v39  ;;  %v824_v53 = vpop.f32.mrb[9].mxu1 }
 0x17b   : > { %v830_v59 = vadd.f32 %v824_v53, %v726_v41  ;;  %v826_v60 = vpop.f32.mrb[10].mxu1 }
 0x17c   : > { %v827_v4 = vpop.f32.mrb[11].mxu1  ;;  %v926_v5 = vpop.f32.mrb[12].mxu0 }
 0x17d   : > { %v933_v6 = vadd.f32 %v926_v5, %v829_v52  ;;  %v928_v12 = vpop.f32.mrb[13].mxu0 }
 0x17e   : > { %v934_v13 = vadd.f32 %v928_v12, %v830_v59  ;;  %v930_v15 = vpop.f32.mrb[14].mxu0 }
 0x17f   : > { %v931_v33 = vpop.f32.mrb[15].mxu0 }
 0x181   : > { %v1030_v16 = vpop.f32.mrb[12].mxu1 }
 0x182   : > { %v1037_v17 = vadd.f32 %v1030_v16, %v933_v6  ;;  %v1032_v19 = vpop.f32.mrb[13].mxu1 }
 0x183   : > { %v1038_v20 = vadd.f32 %v1032_v19, %v934_v13  ;;  %v1034_v21 = vpop.f32.mrb[14].mxu1 }
 0x184   : > { %v1035_v23 = vpop.f32.mrb[15].mxu1  ;;  %v1134_v8 = vpop.f32.mrb[16].mxu0 }
 0x185   : > { %v1141_v24 = vadd.f32 %v1134_v8, %v1037_v17  ;;  %v1136_v25 = vpop.f32.mrb[17].mxu0 }
 0x186   : > { %v1142_v9 = vadd.f32 %v1136_v25, %v1038_v20  ;;  %v1138_v27 = vpop.f32.mrb[18].mxu0 }
 0x187   : > { %v1148_v11 = vadd.f32 %v1146_v22, %v1141_v24  ;;  %v1139_v28 = vpop.f32.mrb[19].mxu0 }
 0x188   : > { %v1149_v29 = vadd.f32 %v1146_v22, %v1142_v9 }
 0x189   : > { %v2296_v30 = vmax.f32 %v1148_v11, 0.0 }
 0x18a   : > { %v2298_v31 = vmax.f32 %v1149_v29, 0.0 }
 0x18c   : > { %v1930_v57 = vpack.i.bf16 %v2298_v31, %v2296_v30  ;;  %v1153_v27 = vpack.c.bf16 %v2298_v31, %v2298_v31 }
 0x18e   : > { %1931 = vrot.lane.b32.xlu0 %v1930_v57, %s1970_s28  ;;  %1921 = vrot.lane.b32.xlu1 %v1930_v57, %s1969_s27 }
 0x192   : > { %1941 = vrot.lane.b32.xlu0 %v1930_v57, %s1973_s7  ;;  %1926 = vrot.lane.b32.xlu1 %v1930_v57, %s1971_s29 }
 0x196   : > { %1951 = vrot.lane.b32.xlu0 %v1930_v57, %s1975_s9  ;;  %1936 = vrot.lane.b32.xlu1 %v1930_v57, %s1972_s30 }
 0x19a   : > { %1717 = vperm.xlu0 %1919, %v254_v34   ;;  %1946 = vrot.lane.b32.xlu1 %v1930_v57, %s1974_s8 }
 0x19e   : > { %1956 = vrot.lane.b32.xlu1 %v1930_v57, %s1976_s10 }
 0x200   : > { %v1932_v35 = vpop.permute.xlu0 %1931  ;;  %v1922_v36 = vpop.permute.xlu1 %1921 }
 0x201   : > { %v1934_v37 = vunpack.i.h.bf16 %v1932_v35  ;;  %v1933_v38 = vunpack.i.l.bf16 %v1932_v35  ;;  %v1924_v46 = vunpack.i.h.bf16 %v1922_v36  ;;  %v1923_v3 = vunpack.i.l.bf16 %v1922_v36 }
 0x203   : > { %v1281_v10 = vsel %vm469_vm0, %v1933_v38, %v1934_v37  ;;  %v1282_v14 = vsel %vm469_vm0, %v1934_v37, %v1933_v38  ;;  %v1169_v39 = vsel %vm315_vm1, %v1923_v3, %v1924_v46  ;;  %v1170_v40 = vsel %vm315_vm1, %v1924_v46, %v1923_v3  ;;  %v1164_v37 = vld [vmem:[%s2439_s3] sm:$0xf] }
 0x204   : > { %v1284_v41 = vpack.c.bf16 %v1281_v10, %v1281_v10  ;;  %v1171_v42 = vpack.c.bf16 %v1170_v40, %v1170_v40  ;;  %v1172_v44 = vpack.c.bf16 %v1169_v39, %v1169_v39  ;;  %v1942_v45 = vpop.permute.xlu0 %1941  ;;  %v1927_v52 = vpop.permute.xlu1 %1926  ;;  %v1283_v5 = vpack.c.bf16 %v1282_v14, %v1282_v14 }
 0x205   : > { %v1944_v53 = vunpack.i.h.bf16 %v1942_v45  ;;  %v1943_v59 = vunpack.i.l.bf16 %v1942_v45  ;;  %v1929_v60 = vunpack.i.h.bf16 %v1927_v52  ;;  %v1928_v4 = vunpack.i.l.bf16 %v1927_v52 }
 0x206   : > { %v1174_v6 = vmul.bf16 %v1172_v44, %v2093_v47  ;;  %v1173_v12 = vmul.bf16 %v1171_v42, %v2096_v48  ;;  %v1286_v47 = vmul.bf16 %v1284_v41, %v2112_v54  ;;  %v1285_v24 = vmul.bf16 %v1283_v5, %v2106_v51  ;;  %v1831_v54 = vld [vmem:[%s2439_s3 + $0x4] sm:$0xf]  ;;  %v1839_v5 = vld [vmem:[%s2439_s3 + $0xc] sm:$0xf] }
 0x207   : > { %v1158_v13 = vsel %vm265_vm4, %v1928_v4, %v1929_v60  ;;  %v1159_v15 = vsel %vm265_vm4, %v1929_v60, %v1928_v4  ;;  %v1464_v19 = vsel %vm731_vm5, %v1944_v53, %v1943_v59  ;;  %v1152_v41 = vpack.c.bf16 %v2296_v30, %v2296_v30 }
 0x208   : > { %v1160_v33 = vpack.c.bf16 %v1159_v15, %v1159_v15  ;;  %v1161_v16 = vpack.c.bf16 %v1158_v13, %v1158_v13  ;;  %v1937_v17 = vpop.permute.xlu1 %1936  ;;  %1832 = vmatprep.subr.msk.bf16.mxu1 %vm367_vm3, %v1174_v6  ;;  %v1952_v22 = vpop.permute.xlu0 %1951  ;;  %v1181_v48 = vsel %vm367_vm3, %v1173_v12, 0  ;;  %v1293_v31 = vsel %vm367_vm3, %v1285_v24, 0 }
 0x209   : > { %v1939_v20 = vunpack.i.h.bf16 %v1937_v17  ;;  %v1938_v21 = vunpack.i.l.bf16 %v1937_v17  ;;  %1187 = vmatpush1.bf16.msra.mxu1 %v1181_v48  ;;  %v1954_v29 = vunpack.i.h.bf16 %v1952_v22  ;;  %v1953_v36 = vunpack.i.l.bf16 %v1952_v22 }
 0x20a   : > { %v1163_v23 = vmul.bf16 %v1161_v16, %v2100_v49  ;;  %v1162_v8 = vmul.bf16 %v1160_v33, %v2103_v50  ;;  %v1463_v49 = vsel %vm731_vm5, %v1943_v59, %v1944_v53  ;;  %v1466_v50 = vpack.c.bf16 %v1464_v19, %v1464_v19  ;;  %1837 = vmatprep.subr.msk.bf16.mxu1 %vm367_vm3, %v1286_v47  ;;  %v1842_v16 = vld [vmem:[%s2439_s3 + $0x10] sm:$0xf]  ;;  %v1851_v47 = vld [vmem:[%s2439_s3 + $0x1c] sm:$0xf] }
 0x20b   : > { %v1345_v25 = vsel %vm573_vm2, %v1938_v21, %v1939_v20  ;;  %v1346_v9 = vsel %vm573_vm2, %v1939_v20, %v1938_v21  ;;  %v1465_v40 = vpack.c.bf16 %v1463_v49, %v1463_v49  ;;  %v1591_v30 = vsel %vm939_vm8, %v1953_v36, %v1954_v29  ;;  %v1848_v20 = vld [vmem:[%s2439_s3 + $0x18] sm:$0xf] }
 0x20c   : > { %v1347_v11 = vpack.c.bf16 %v1346_v9, %v1346_v9  ;;  %v1348_v51 = vpack.c.bf16 %v1345_v25, %v1345_v25  ;;  %v1947_v28 = vpop.permute.xlu1 %1946  ;;  %1834 = vmatprep.subr.msk.bf16.mxu0 %vm367_vm3, %v1163_v23  ;;  %v1231_v35 = vsel %vm367_vm3, %v1162_v8, 0  ;;  %1833 = vmatmul.mubr.msk.bf16.vlgmr.msra.gmra.mrb[16].mxu1 %vm363_vm6, %v1831_v54  ;;  %v1411_v4 = vsel %vm367_vm3, %v1152_v41, 0 }
 0x20d   : > { %v1949_v57 = vunpack.i.h.bf16 %v1947_v28  ;;  %v1948_v34 = vunpack.i.l.bf16 %v1947_v28  ;;  %1237 = vmatpush1.bf16.msra.mxu0 %v1231_v35  ;;  %1299 = vmatpush1.bf16.msra.mxu1 %v1293_v31  ;;  %v1467_v59 = vmul.bf16 %v1465_v40, %v2134_v63  ;;  %v1593_v63 = vpack.c.bf16 %v1591_v30, %v1591_v30 }
 0x20e   : > { %v1350_v38 = vmul.bf16 %v1348_v51, %v2115_v55  ;;  %v1349_v46 = vmul.bf16 %v1347_v11, %v2118_v56  ;;  %1330 = vmatprep.mubr.bf16.mxu1 %v1968_v0  ;;  %1843 = vmatprep.subr.msk.bf16.mxu1 %vm367_vm3, %v1153_v27  ;;  %v1468_v55 = vmul.bf16 %v1466_v50, %v2131_v62  ;;  %v1836_v62 = vld [vmem:[%s2439_s3 + $0x8] sm:$0xf] }
 0x20f   : > { %v1528_v3 = vsel %vm835_vm7, %v1949_v57, %v1948_v34  ;;  %v1592_v56 = vsel %vm939_vm8, %v1954_v29, %v1953_v36  ;;  %v1527_v42 = vsel %vm835_vm7, %v1948_v34, %v1949_v57  ;;  %v1595_v17 = vmul.bf16 %v1593_v63, %v2244_v61 }
 0x210   : > { %v1530_v10 = vpack.c.bf16 %v1528_v3, %v1528_v3  ;;  %v1957_v14 = vpop.permute.xlu1 %1956  ;;  %1840 = vmatprep.subr.msk.bf16.mxu0 %vm367_vm3, %v1350_v38  ;;  %v1357_v39 = vsel %vm367_vm3, %v1349_v46, 0  ;;  %1835 = vmatmul.mubr.msk.bf16.vlgmr.msra.gmra.mrb[20].mxu0 %vm363_vm6, %v1164_v37  ;;  %v1594_v53 = vpack.c.bf16 %v1592_v56, %v1592_v56  ;;  %v1529_v60 = vpack.c.bf16 %v1527_v42, %v1527_v42 }
 0x211   : > { %1363 = vmatpush1.bf16.msra.mxu0 %v1357_v39  ;;  %1394 = vmatprep.mubr.bf16.mxu0 %v1968_v0  ;;  %v1959_v44 = vunpack.i.h.bf16 %v1957_v14  ;;  %v1958_v45 = vunpack.i.l.bf16 %v1957_v14  ;;  %v1603_v61 = vsel %vm367_vm3, %v1595_v17, 0 }
 0x212   : > { %1846 = vmatprep.subr.msk.bf16.mxu0 %vm367_vm3, %v1468_v55  ;;  %v1532_v52 = vmul.bf16 %v1530_v10, %v2188_v18  ;;  %v1475_v18 = vsel %vm367_vm3, %v1467_v59, 0  ;;  %v1596_v12 = vmul.bf16 %v1594_v53, %v2237_v58  ;;  %v1531_v15 = vmul.bf16 %v1529_v60, %v2220_v32 }
 0x213   : > { %v1656_v6 = vsel %vm1043_vm9, %v1959_v44, %v1958_v45  ;;  %v1655_v33 = vsel %vm1043_vm9, %v1958_v45, %v1959_v44 }
 0x214   : > { %1838 = vmatmul.mubr.msk.bf16.vlgmr.msra.gmra.mrb[20].mxu1 %vm363_vm6, %v1836_v62  ;;  %v1658_v13 = vpack.c.bf16 %v1656_v6, %v1656_v6  ;;  %v1657_v19 = vpack.c.bf16 %v1655_v33, %v1655_v33  ;;  %v1539_v32 = vsel %vm367_vm3, %v1531_v15, 0 }
 0x215   : > { %1417 = vmatpush1.bf16.msra.mxu1 %v1411_v4  ;;  %1448 = vmatprep.mubr.bf16.mxu1 %v1968_v0 }
 0x216   : > { %1849 = vmatprep.subr.msk.bf16.mxu1 %vm367_vm3, %v1532_v52  ;;  %v1660_v58 = vmul.bf16 %v1658_v13, %v2252_v43  ;;  %v1659_v43 = vmul.bf16 %v1657_v19, %v2266_v7  ;;  %v1854_v7 = vld [vmem:[%s2439_s3 + $0x20] sm:$0xf] }
 0x218   : > { %1841 = vmatmul.mubr.msk.bf16.vlgmr.msra.gmra.mrb[24].mxu0 %vm363_vm6, %v1839_v5  ;;  %v1667_v21 = vsel %vm367_vm3, %v1659_v43, 0 }
 0x219   : > { %1481 = vmatpush1.bf16.msra.mxu0 %v1475_v18  ;;  %1512 = vmatprep.mubr.bf16.mxu0 %v1968_v0  ;;  %v1718_v33 = vpop.permute.xlu0 %1717 }
 0x21a   : > { %1852 = vmatprep.subr.msk.bf16.mxu0 %vm367_vm3, %v1596_v12 }
 0x21c   : > { %1844 = vmatmul.mubr.msk.bf16.vlgmr.msra.gmra.mrb[24].mxu1 %vm363_vm6, %v1842_v16 }
 0x21d   : > { %1545 = vmatpush1.bf16.msra.mxu1 %v1539_v32  ;;  %1576 = vmatprep.mubr.bf16.mxu1 %v1968_v0 }
 0x21e   : > { %1855 = vmatprep.subr.msk.bf16.mxu1 %vm367_vm3, %v1660_v58 }
 0x220   : > { %1847 = vmatmul.mubr.msk.bf16.vlgmr.msra.gmra.mrb[28].mxu0 %vm363_vm6, %v1845_v26 }
 0x221   : > { %1609 = vmatpush1.bf16.msra.mxu0 %v1603_v61  ;;  %1640 = vmatprep.mubr.bf16.mxu0 %v1968_v0 }
 0x224   : > { %1850 = vmatmul.mubr.msk.bf16.vlgmr.msra.gmra.mrb[28].mxu1 %vm363_vm6, %v1848_v20 }
 0x225   : > { %1673 = vmatpush1.bf16.msra.mxu1 %v1667_v21  ;;  %1704 = vmatprep.mubr.bf16.mxu1 %v1968_v0 }
 0x228   : > { %1853 = vmatmul.mubr.msk.bf16.vlgmr.msra.gmra.mrb[32].mxu0 %vm363_vm6, %v1851_v47 }
 0x22c   : > { %1856 = vmatmul.mubr.msk.bf16.vlgmr.msra.gmra.mrb[32].mxu1 %vm363_vm6, %v1854_v7 }
 0x2df   : > { %v1220_v22 = vpop.f32.mrb[16].mxu1 }
 0x2e0   : > { %v1222_v48 = vpop.f32.mrb[17].mxu1 }
 0x2e1   : > { %v1224_v23 = vpop.f32.mrb[18].mxu1 }
 0x2e2   : > { %v1225_v24 = vpop.f32.mrb[19].mxu1 }
 0x2e3   : > { %v1270_v8 = vpop.f32.mrb[20].mxu0 }
 0x2e4   : > { %v1271_v25 = vadd.f32 %v1270_v8, %v1220_v22  ;;  %v1272_v9 = vpop.f32.mrb[21].mxu0 }
 0x2e5   : > { %v1273_v54 = vadd.f32 %v1272_v9, %v1222_v48  ;;  %v1274_v27 = vpop.f32.mrb[22].mxu0 }
 0x2e6   : > { %v1275_v49 = vpop.f32.mrb[23].mxu0 }
 0x2e7   : > { %v1332_v50 = vpop.f32.mrb[20].mxu1 }
 0x2e8   : > { %v1339_v0 = vadd.f32 %v1332_v50, %v1271_v25  ;;  %v1334_v11 = vpop.f32.mrb[21].mxu1 }
 0x2e9   : > { %v1340_v51 = vadd.f32 %v1334_v11, %v1273_v54  ;;  %v1336_v28 = vpop.f32.mrb[22].mxu1 }
 0x2ea   : > { %v1337_v57 = vpop.f32.mrb[23].mxu1 }
 0x2eb   : > { %v1396_v29 = vpop.f32.mrb[24].mxu0 }
 0x2ec   : > { %v1403_v34 = vadd.f32 %v1396_v29, %v1339_v0  ;;  %v1398_v35 = vpop.f32.mrb[25].mxu0 }
 0x2ed   : > { %v1404_v36 = vadd.f32 %v1398_v35, %v1340_v51  ;;  %v1400_v31 = vpop.f32.mrb[26].mxu0 }
 0x2ee   : > { %v1401_v37 = vpop.f32.mrb[27].mxu0 }
 0x2ef   : > { %v1450_v38 = vpop.f32.mrb[24].mxu1 }
 0x2f0   : > { %v1457_v46 = vadd.f32 %v1450_v38, %v1403_v34  ;;  %v1452_v3 = vpop.f32.mrb[25].mxu1 }
 0x2f1   : > { %v1458_v10 = vadd.f32 %v1452_v3, %v1404_v36  ;;  %v1454_v14 = vpop.f32.mrb[26].mxu1 }
 0x2f2   : > { %v1455_v40 = vpop.f32.mrb[27].mxu1 }
 0x2f3   : > { %v1514_v39 = vpop.f32.mrb[28].mxu0 }
 0x2f4   : > { %v1521_v55 = vadd.f32 %v1514_v39, %v1457_v46  ;;  %v1516_v56 = vpop.f32.mrb[29].mxu0 }
 0x2f5   : > { %v1522_v41 = vadd.f32 %v1516_v56, %v1458_v10  ;;  %v1518_v42 = vpop.f32.mrb[30].mxu0 }
 0x2f6   : > { %v1519_v44 = vpop.f32.mrb[31].mxu0 }
 0x2f7   : > { %v1578_v45 = vpop.f32.mrb[28].mxu1 }
 0x2f8   : > { %v1585_v62 = vadd.f32 %v1578_v45, %v1521_v55  ;;  %v1580_v52 = vpop.f32.mrb[29].mxu1 }
 0x2f9   : > { %v1586_v53 = vadd.f32 %v1580_v52, %v1522_v41  ;;  %v1582_v59 = vpop.f32.mrb[30].mxu1 }
 0x2fa   : > { %v1583_v60 = vpop.f32.mrb[31].mxu1 }
 0x2fb   : > { %v1642_v30 = vpop.f32.mrb[32].mxu0 }
 0x2fc   : > { %v1649_v4 = vadd.f32 %v1642_v30, %v1585_v62  ;;  %v1644_v5 = vpop.f32.mrb[33].mxu0 }
 0x2fd   : > { %v1650_v6 = vadd.f32 %v1644_v5, %v1586_v53  ;;  %v1646_v63 = vpop.f32.mrb[34].mxu0 }
 0x2fe   : > { %v1647_v18 = vpop.f32.mrb[35].mxu0 }
 0x2ff   : > { %v1706_v12 = vpop.f32.mrb[32].mxu1 }
 0x300   : > { %v1713_v13 = vadd.f32 %v1706_v12, %v1649_v4  ;;  %v1708_v15 = vpop.f32.mrb[33].mxu1 }
 0x301   : > { %v1714_v16 = vadd.f32 %v1708_v15, %v1650_v6  ;;  %v1710_v17 = vpop.f32.mrb[34].mxu1 }
 0x302   : > { %v1720_v19 = vadd.f32 %v1718_v33, %v1713_v13  ;;  %v1711_v58 = vpop.f32.mrb[35].mxu1 }
 0x303   : > { %v1721_v32 = vadd.f32 %v1718_v33, %v1714_v16 }
 0x304   : > { %v1722_v26 = vadd.f32 %v1720_v19, %v2031_v1 }
 0x305   : > { %v1723_v61 = vadd.f32 %v1721_v32, %v2033_v2 }
 0x306   : > { %1724 = vst [vmem:[%s251_s25] sm:$0xff] %v1722_v26 }
 0x307   : > { %1725 = vst [vmem:[%s251_s25 + $0x8] sm:$0xff] %v1723_v61 }
 0x308 PF: > { %s16_s21 = sadd.s32 1, %s1966_s21  }
 0x309   : > { %p13_p4 = scmp.ge.s32.totalorder %s16_s21, 4  }
 0x30b   :  { %15 = sbr.rel (!%p13_p4) target bundleno = 1 (0x1), region = 97 }

</bundles_post_ra>
